<compile_context>
chip_gen: v7x
topology: tpu7x:2x2x1
jax: 0.10.0
libtpu: 0.0.40
codegen_flags: <defaults>
</compile_context>

<pallas_src>
import jax
import jax.numpy as jnp
from jax.experimental import pallas as pl
from jax.experimental.pallas import tpu as pltpu


def _round_up(x, m):
    return ((x + m - 1) // m) * m


def _ceil_div(a, b):
    return -(-a // b)


# ---------------------------------------------------------------------------
# Kernels
# ---------------------------------------------------------------------------
def _proggan_kernel_noshift(z_ref, w_ref, b_ref, o_ref):
    # z_ref: (TB, Z) f32   w_ref: (Z, TN) bf16   b_ref: (1, TN) f32
    # o_ref: (TB, TN) out_dtype
    acc = jnp.dot(z_ref[...].astype(w_ref.dtype), w_ref[...],
                  preferred_element_type=jnp.float32)          # MXU bf16, f32 acc
    o_ref[...] = (acc + b_ref[...]).astype(o_ref.dtype)        # f32 bias add (VPU)


def _proggan_kernel_shift(z_ref, s_ref, w_ref, b_ref, o_ref):
    # s_ref is either (TB, Z) (per-row shift) or (1, Z) (broadcast shift);
    # jnp broadcasting handles both.  Shift add stays f32 (v5e: no bf16 VPU).
    zs = z_ref[...] + s_ref[...]
    acc = jnp.dot(zs.astype(w_ref.dtype), w_ref[...],
                  preferred_element_type=jnp.float32)
    o_ref[...] = (acc + b_ref[...]).astype(o_ref.dtype)


# ---------------------------------------------------------------------------
# Wrapper
# ---------------------------------------------------------------------------
class ProgGANWrapperPallas:
    """JAX/Pallas port of ProgGANWrapper with a synthetic first-stage generator."""

    def __init__(self, key, out_channels=8, out_hw=4, dim_z=512,
                 out_dtype=jnp.float32):
        self.dim_z = dim_z
        # Stored for parity with the PyTorch wrapper; its forward() never
        # branches on it either, so behavior matches the spec.
        self.shift_in_w_space = False
        self.out_channels = out_channels
        self.out_hw = out_hw
        self.out_dtype = out_dtype
        self.n_raw = out_channels * out_hw * out_hw
        self.n_pad = _round_up(self.n_raw, 128)   # lane-dense output (unmasked vst)

        k_w, k_b = jax.random.split(key)
        w = (jax.random.normal(k_w, (dim_z, self.n_raw), dtype=jnp.float32)
             / jnp.sqrt(jnp.float32(dim_z)))
        b = jax.random.normal(k_b, (1, self.n_raw), dtype=jnp.float32) * 0.01
        pad_n = self.n_pad - self.n_raw
        # bf16 weight: halves HBM->VMEM weight traffic, native MXU bf16 path.
        self.w = jnp.pad(w, ((0, 0), (0, pad_n))).astype(jnp.bfloat16)
        self.b = jnp.pad(b, ((0, 0), (0, pad_n))).astype(jnp.float32)

        # jit the three dispatch flavors so prologue/epilogue ops fuse.
        self._fwd_noshift = jax.jit(self._forward_noshift)
        self._fwd_shift_bcast = jax.jit(self._forward_shift_bcast)
        self._fwd_shift_per_row = jax.jit(self._forward_shift_per_row)

    # -- tiling -------------------------------------------------------------
    def _tiles(self, batch):
        # Batch tile: multiple of 16 (bf16 sublane packing), cap 1024.
        tb = min(1024, _round_up(batch, 16))
        if batch > 256:
            # Guarantee >= 2 grid steps so v7x's two TensorCores both get work.
            tb = min(tb, _round_up(_ceil_div(batch, 2), 16))
        gb = _ceil_div(batch, tb)
        # N tile: lane-dense multiple of 128; bounds VMEM at the real N=8192
        # first block.  At the demo width this is a single step.
        tn = min(self.n_pad, 2048)
        gn = _ceil_div(self.n_pad, tn)
        return tb, gb, tn, gn

    def _specs(self, tb, tn):
        # Grid is (N outer, batch inner): weight/bias tile is constant across
        # the inner batch loop, so it stays VMEM-resident and — being constant
        # — only needs a single pipeline buffer (Buffered(1)).
        z_spec = pl.BlockSpec((tb, self.dim_z), lambda j, i: (i, 0))
        w_spec = pl.BlockSpec((self.dim_z, tn), lambda j, i: (0, j),
                              pipeline_mode=pl.Buffered(1))
        b_spec = pl.BlockSpec((1, tn), lambda j, i: (0, j),
                              pipeline_mode=pl.Buffered(1))
        o_spec = pl.BlockSpec((tb, tn), lambda j, i: (i, j))
        # NOTE: when scaling to the real first block (N=8192, v7x 64 MiB VMEM)
        # also set pltpu.CompilerParams(vmem_limit_bytes=...) explicitly.
        return z_spec, w_spec, b_spec, o_spec

    def _cost(self, batch, shift_rows):
        out_bytes = batch * self.n_pad * jnp.dtype(self.out_dtype).itemsize
        return pl.CostEstimate(
            flops=2 * batch * self.dim_z * self.n_pad,
            transcendentals=0,
            bytes_accessed=(batch * self.dim_z * 4          # z (f32)
                            + shift_rows * self.dim_z * 4   # shift (f32)
                            + self.dim_z * self.n_pad * 2   # W (bf16)
                            + self.n_pad * 4                # bias (f32)
                            + out_bytes))

    def _to_image(self, flat, batch):
        return flat[:, :self.n_raw].reshape(
            batch, self.out_channels, self.out_hw, self.out_hw)

    # -- dispatch flavors ----------------------------------------------------
    def _forward_noshift(self, z):
        batch = z.shape[0]
        tb, gb, tn, gn = self._tiles(batch)
        z_spec, w_spec, b_spec, o_spec = self._specs(tb, tn)
        flat = pl.pallas_call(
            _proggan_kernel_noshift,
            out_shape=jax.ShapeDtypeStruct((batch, self.n_pad), self.out_dtype),
            grid_spec=pltpu.PrefetchScalarGridSpec(
                num_scalar_prefetch=0, grid=(gn, gb),
                in_specs=[z_spec, w_spec, b_spec],
                out_specs=o_spec),
            compiler_params=pltpu.CompilerParams(
                dimension_semantics=("parallel", "parallel")),
            cost_estimate=self._cost(batch, 0),
        )(z.astype(jnp.float32), self.w, self.b)
        return self._to_image(flat, batch)

    def _forward_shift_bcast(self, z, shift):            # shift: (1, Z)
        batch = z.shape[0]
        tb, gb, tn, gn = self._tiles(batch)
        z_spec, w_spec, b_spec, o_spec = self._specs(tb, tn)
        s_spec = pl.BlockSpec((1, self.dim_z), lambda j, i: (0, 0),
                              pipeline_mode=pl.Buffered(1))
        flat = pl.pallas_call(
            _proggan_kernel_shift,
            out_shape=jax.ShapeDtypeStruct((batch, self.n_pad), self.out_dtype),
            grid_spec=pltpu.PrefetchScalarGridSpec(
                num_scalar_prefetch=0, grid=(gn, gb),
                in_specs=[z_spec, s_spec, w_spec, b_spec],
                out_specs=o_spec),
            compiler_params=pltpu.CompilerParams(
                dimension_semantics=("parallel", "parallel")),
            cost_estimate=self._cost(batch, 1),
        )(z.astype(jnp.float32), shift.astype(jnp.float32), self.w, self.b)
        return self._to_image(flat, batch)

    def _forward_shift_per_row(self, z, shift):          # shift: (B, Z)
        batch = z.shape[0]
        tb, gb, tn, gn = self._tiles(batch)
        z_spec, w_spec, b_spec, o_spec = self._specs(tb, tn)
        s_spec = pl.BlockSpec((tb, self.dim_z), lambda j, i: (i, 0))
        flat = pl.pallas_call(
            _proggan_kernel_shift,
            out_shape=jax.ShapeDtypeStruct((batch, self.n_pad), self.out_dtype),
            grid_spec=pltpu.PrefetchScalarGridSpec(
                num_scalar_prefetch=0, grid=(gn, gb),
                in_specs=[z_spec, s_spec, w_spec, b_spec],
                out_specs=o_spec),
            compiler_params=pltpu.CompilerParams(
                dimension_semantics=("parallel", "parallel")),
            cost_estimate=self._cost(batch, batch),
        )(z.astype(jnp.float32), shift.astype(jnp.float32), self.w, self.b)
        return self._to_image(flat, batch)

    # -- public forward (matches PyTorch semantics) --------------------------
    def __call__(self, z, shift=None):
        assert z.ndim == 2 and z.shape[1] == self.dim_z
        if shift is None:
            return self._fwd_noshift(z)
        shift = jnp.asarray(shift)
        if shift.ndim == 1:
            shift = shift.reshape(1, self.dim_z)
        if shift.shape[0] == 1:
            return self._fwd_shift_bcast(z, shift)
        return self._fwd_shift_per_row(z, shift)


if __name__ == "__main__":
    key = jax.random.PRNGKey(0)
    k_params, k_z, k_shift = jax.random.split(key, 3)

    model = ProgGANWrapperPallas(k_params, out_channels=8, out_hw=4, dim_z=512)

    B = 2
    z = jax.random.normal(k_z, (B, model.dim_z), dtype=jnp.float32)
    shift = 0.1 * jax.random.normal(k_shift, (B, model.dim_z), dtype=jnp.float32)

    img_no_shift = model(z)                 # forward(z)
    img_shift = model(z, shift)             # forward(z + shift), per-row shift
    img_shift_b = model(z, shift[:1])       # forward(z + shift), broadcast shift
    jax.block_until_ready((img_no_shift, img_shift, img_shift_b))

    # sanity: pure-JAX reference following the same bf16-MXU math path
    wq = model.w            # (Z, Np) bf16
    bq = model.b            # (1, Np) f32
    n = model.n_raw

    def ref(zz):
        acc = jnp.dot(zz.astype(jnp.bfloat16), wq,
                      preferred_element_type=jnp.float32) + bq
        return acc[:, :n].reshape(B, 8, 4, 4)

    ref_ns = ref(z)
    ref_s = ref(z + shift)
    ref_sb = ref(z + shift[:1])

    assert jnp.allclose(img_no_shift, ref_ns, atol=1e-2, rtol=1e-2)
    assert jnp.allclose(img_shift, ref_s, atol=1e-2, rtol=1e-2)
    assert jnp.allclose(img_shift_b, ref_sb, atol=1e-2, rtol=1e-2)

    print("KERNEL_OK")
</pallas_src>

<mosaic_0001>
module attributes {stable_mosaic.version = 11 : i64} {
  func.func @_proggan_kernel_noshift(%arg0: i32, %arg1: i32, %arg2: memref<16x512xf32, #tpu.memory_space<vmem>>, %arg3: memref<512x128xbf16, #tpu.memory_space<vmem>>, %arg4: memref<1x128xf32, #tpu.memory_space<vmem>>, %arg5: memref<16x128xf32, #tpu.memory_space<vmem>>) attributes {dimension_semantics = [#tpu.dimension_semantics<parallel>, #tpu.dimension_semantics<parallel>], iteration_bounds = array<i64: 1, 1>, scalar_prefetch = 0 : i64, scratch_operands = 0 : i64, tpu.core_type = #tpu.core_type<tc>, window_params = [{transform_indices = @transform_0, window_bounds = array<i64: 16, 512>}, {pipeline_mode = #tpu.pipeline_mode<synchronous>, transform_indices = @transform_1, window_bounds = array<i64: 512, 128>}, {pipeline_mode = #tpu.pipeline_mode<synchronous>, transform_indices = @transform_2, window_bounds = array<i64: 1, 128>}, {transform_indices = @transform_3, window_bounds = array<i64: 16, 128>}]} {
    %c0 = arith.constant 0 : index
    %c0_0 = arith.constant 0 : index
    %0 = vector.load %arg2[%c0, %c0_0] : memref<16x512xf32, #tpu.memory_space<vmem>>, vector<16x512xf32>
    %1 = arith.truncf %0 : vector<16x512xf32> to vector<16x512xbf16>
    %c0_1 = arith.constant 0 : index
    %c0_2 = arith.constant 0 : index
    %2 = vector.load %arg3[%c0_1, %c0_2] : memref<512x128xbf16, #tpu.memory_space<vmem>>, vector<512x128xbf16>
    %cst = arith.constant dense<0.000000e+00> : vector<16x128xf32>
    %3 = tpu.matmul %1, %2, %cst {dimension_numbers = #tpu.dot_dimension_numbers<[1], [0], [0], [1], [0, 0, 1, 1], [], []>} : vector<16x512xbf16>, vector<512x128xbf16>, vector<16x128xf32> -> vector<16x128xf32>
    %c0_3 = arith.constant 0 : index
    %c0_4 = arith.constant 0 : index
    %4 = vector.load %arg4[%c0_3, %c0_4] : memref<1x128xf32, #tpu.memory_space<vmem>>, vector<1x128xf32>
    %5 = vector.broadcast %4 : vector<1x128xf32> to vector<16x128xf32>
    %6 = arith.addf %3, %5 : vector<16x128xf32>
    %c0_5 = arith.constant 0 : index
    %c0_6 = arith.constant 0 : index
    %7 = vector.load %arg5[%c0_5, %c0_6] : memref<16x128xf32, #tpu.memory_space<vmem>>, vector<16x128xf32>
    tpu.vector_store %arg5[%c0_5, %c0_6], %6 {strides = array<i32>} : memref<16x128xf32, #tpu.memory_space<vmem>>, vector<16x128xf32>,
    return
  }
  func.func @transform_0(%arg0: i32, %arg1: i32) -> (i32, i32) {
    %c0_i32 = arith.constant 0 : i32
    %c0_i32_0 = arith.constant 0 : i32
    return %arg1, %c0_i32 : i32, i32
  }
  func.func @transform_1(%arg0: i32, %arg1: i32) -> (i32, i32) {
    %c0_i32 = arith.constant 0 : i32
    %c0_i32_0 = arith.constant 0 : i32
    return %c0_i32, %arg0 : i32, i32
  }
  func.func @transform_2(%arg0: i32, %arg1: i32) -> (i32, i32) {
    %c0_i32 = arith.constant 0 : i32
    %c0_i32_0 = arith.constant 0 : i32
    return %c0_i32, %arg0 : i32, i32
  }
  func.func @transform_3(%arg0: i32, %arg1: i32) -> (i32, i32) {
    %c0_i32 = arith.constant 0 : i32
    return %arg1, %arg0 : i32, i32
  }
}

</mosaic_0001>

<bundles_post_ra>
// kernel: _forward_noshift.1
= control target key start
LH: loop header
LB: loop body
LE: loop exit
PB: predicated region body
PF: predicated region fallthrough
CT: control target
= control target key end

     0   :  { %8 = vsyncpa [#allocation3], 0  ;;  %s764_s0 = inlined_call_operand.hbm [shape: f32[2,512], index: 0, kind: input, shape index: {}]   ;;  %s765_s1 = inlined_call_operand.hbm [shape: bf16[512,128], index: 1, kind: input, shape index: {}]   ;;  %s766_s2 = inlined_call_operand.vmem [shape: f32[1,128], index: 2, kind: input, shape index: {}]   ;;  %s767_s3 = inlined_call_operand.vmem [shape: f32[2,128], index: 3, kind: output, shape index: {}]  }
   0x1   :  { %9 = vsyncpa [#allocation5], 0 }
   0x2   :  { %14 = vsyncadd [#allocation3], 896  ;;  %s707_s12 = smov [#allocation2]   ;;  %s659_s16 = scalar_lea.hbm %s764_s0, 128 }
   0x3   :  { %s15_s13 = sshll.u32 %s707_s12, 4  ;;  %p660_p0 = scmp.ne.s32.totalorder %s764_s0, %s659_s16  ;;  %s16_s13 = int_to_ptr.vmem [resolvable:$true] %s15_s13 }
   0x4   :  { %p663_p1 = scmp.lt.u32.totalorder %s659_s16, %s764_s0 }
   0x6   :  { %p665_p2 = pnand %p663_p1, %p660_p0 }
   0x8   :  { %668 = shalt.err (!%p665_p2)
}
   0x9   :  { %s669_s21 = scalar_lea.vmem %s16_s13, 128  ;;  %s673_s22 = scalar_lea.vmem %s16_s13, 1024 }
   0xa   :  { %p670_p3 = scmp.ne.s32.totalorder %s16_s13, %s669_s21  ;;  %p674_p4 = scmp.lt.s32.totalorder %s16_s13, %s16_s13 }
   0xb   :  { %p675_p5 = scmp.lt.s32.totalorder %s673_s22, %s669_s21 }
   0xd   :  { %p676_p6 = por %p675_p5, %p674_p4 }
   0xf   :  { %p677_p7 = pnand %p676_p6, %p670_p3 }
  0x11   :  { %680 = shalt.err (!%p677_p7)
}
  0x12   :  { %s708_s23 = smov 128   ;;  %s709_s24 = smov 8  }
  0x13   :  { %21 = dma.hbm_to_vmem [thread:$0]  %s764_s0, 128, %s16_s13, [#allocation3], %s708_s23, %s708_s23, %s709_s24  }
  0x14   :  { %s710_s27 = smov [#allocation4]   ;;  %s681_s4 = scalar_lea.hbm %s765_s1, 4096 }
  0x15   :  { %s27_s28 = sshll.u32 %s710_s27, 4  ;;  %p682_p8 = scmp.ne.s32.totalorder %s765_s1, %s681_s4  ;;  %s28_s28 = int_to_ptr.vmem [resolvable:$true] %s27_s28 }
  0x16   :  { %p685_p9 = scmp.lt.u32.totalorder %s681_s4, %s765_s1 }
  0x18   :  { %p687_p10 = pnand %p685_p9, %p682_p8 }
  0x1a   :  { %690 = shalt.err (!%p687_p10)
}
  0x1b   :  { %s691_s9 = scalar_lea.vmem %s28_s28, 4096  ;;  %p696_p12 = scmp.lt.s32.totalorder %s28_s28, %s28_s28 }
  0x1c   :  { %p692_p11 = scmp.ne.s32.totalorder %s28_s28, %s691_s9  ;;  %p697_p13 = scmp.lt.s32.totalorder %s691_s9, %s691_s9 }
  0x1e   :  { %p698_p0 = por %p697_p13, %p696_p12 }
  0x20   :  { %p699_p1 = pnand %p698_p0, %p692_p11 }
  0x22   :  { %702 = shalt.err (!%p699_p1)
}
  0x23   :  { %s711_s0 = smov 64   ;;  %s712_s10 = smov 4  }
  0x24   :  { %33 = dma.hbm_to_vmem [thread:$0]  %s765_s1, 4096, %s28_s28, [#allocation5], %s711_s0, %s711_s0, %s712_s10  }
  0x25   :  { %703 = dma.done.wait [#allocation3], 1024  }
  0x26   :  { %704 = vsyncadd [#allocation3], 4294966272 }
  0x27   :  { %705 = dma.done.wait [#allocation5], 4096  }
  0x28   :  { %706 = vsyncadd [#allocation5], 4294963200  ;;  %v615_v0 = vld [vmem:[#allocation4 + $0x40] sm:$0xff]   ;;  %v619_v4 = vld [vmem:[#allocation4 + $0x48] sm:$0xff]   ;;  %v713_v25 = vmov 1983009808   ;;  %v66_v27 = vlaneseq }
  0x29   :  { %v616_v1 = vld [vmem:[#allocation4 + $0xc0] sm:$0xff]   ;;  %564 = vmatprep.subr.bf16.mxu0 %v615_v0  ;;  %v620_v5 = vld [vmem:[#allocation4 + $0xc8] sm:$0xff]   ;;  %v623_v8 = vld [vmem:[#allocation4 + $0x50] sm:$0xff]   ;;  %v64_v26 = vunpack.c.l.s4 %v713_v25 }
  0x2a   :  { %v617_v2 = vld [vmem:[#allocation4] sm:$0xff]   ;;  %586 = vmatprep.subr.bf16.mxu1 %v616_v1  ;;  %v621_v6 = vld [vmem:[#allocation4 + $0x8] sm:$0xff]   ;;  %v624_v9 = vld [vmem:[#allocation4 + $0xd0] sm:$0xff]   ;;  %v67_v33 = vshrl.u32 %v66_v27, 7 }
  0x2b   :  { %v618_v3 = vld [vmem:[#allocation4 + $0x80] sm:$0xff]   ;;  %565 = vmatpush3.bf16.msra.mxu0 %v617_v2  ;;  %v622_v7 = vld [vmem:[#allocation4 + $0x88] sm:$0xff]   ;;  %v625_v10 = vld [vmem:[#allocation4 + $0x10] sm:$0xff]   ;;  %v65_v32 = vunpack.c.0.s8 %v64_v26 }
  0x2c   :  { %587 = vmatpush3.bf16.msra.mxu1 %v618_v3  ;;  %566 = vmatprep.subr.bf16.mxu0 %v619_v4  ;;  %v626_v11 = vld [vmem:[#allocation4 + $0x90] sm:$0xff]   ;;  %v627_v12 = vld [vmem:[#allocation4 + $0x58] sm:$0xff]   ;;  %v631_v16 = vld [vmem:[#allocation4 + $0x60] sm:$0xff]  }
  0x2d   :  { %588 = vmatprep.subr.bf16.mxu1 %v620_v5  ;;  %v628_v13 = vld [vmem:[#allocation4 + $0xd8] sm:$0xff]   ;;  %v632_v17 = vld [vmem:[#allocation4 + $0xe0] sm:$0xff]   ;;  %v635_v20 = vld [vmem:[#allocation4 + $0x68] sm:$0xff]   ;;  %v68_v37 = vsub.s32 %v65_v32, %v67_v33 }
  0x2e   :  { %v629_v14 = vld [vmem:[#allocation4 + $0x18] sm:$0xff]   ;;  %v633_v18 = vld [vmem:[#allocation4 + $0x20] sm:$0xff]   ;;  %v636_v21 = vld [vmem:[#allocation4 + $0xe8] sm:$0xff]  }
  0x2f   :  { %567 = vmatpush3.bf16.msra.mxu0 %v621_v6  ;;  %v630_v15 = vld [vmem:[#allocation4 + $0x98] sm:$0xff]   ;;  %v634_v19 = vld [vmem:[#allocation4 + $0xa0] sm:$0xff]   ;;  %v637_v22 = vld [vmem:[#allocation4 + $0x28] sm:$0xff]  }
  0x30   :  { %589 = vmatpush3.bf16.msra.mxu1 %v622_v7  ;;  %568 = vmatprep.subr.bf16.mxu0 %v623_v8  ;;  %v638_v23 = vld [vmem:[#allocation4 + $0xa8] sm:$0xff]   ;;  %v639_v24 = vld [vmem:[#allocation4 + $0x70] sm:$0xff]   ;;  %v643_v31 = vld [vmem:[#allocation4 + $0x78] sm:$0xff]  }
  0x31   :  { %590 = vmatprep.subr.bf16.mxu1 %v624_v9  ;;  %v640_v28 = vld [vmem:[#allocation4 + $0xf0] sm:$0xff]   ;;  %v644_v34 = vld [vmem:[#allocation4 + $0xf8] sm:$0xff]   ;;  %v647_v38 = vld [vmem:[#allocation2] ss:$8 sps:$4 sm:$0xff]  }
  0x32   :  { %v641_v29 = vld [vmem:[#allocation4 + $0x30] sm:$0xff]   ;;  %v645_v35 = vld [vmem:[#allocation4 + $0x38] sm:$0xff]   ;;  %v651_v40 = vld [vmem:[#allocation2 + $0x20] ss:$8 sps:$4 sm:$0xff]   ;;  %v69_v42 = vrot.slane %v647_v38, %v68_v37 }
  0x33   :  { %569 = vmatpush3.bf16.msra.mxu0 %v625_v10  ;;  %v642_v30 = vld [vmem:[#allocation4 + $0xb0] sm:$0xff]   ;;  %v646_v36 = vld [vmem:[#allocation4 + $0xb8] sm:$0xff]   ;;  %v655_v43 = vld [vmem:[#allocation2 + $0x4] ss:$8 sps:$4 sm:$0xff]   ;;  %v105_v47 = vrot.slane %v651_v40, %v68_v37 }
  0x34   :  { %591 = vmatpush3.bf16.msra.mxu1 %v626_v11  ;;  %570 = vmatprep.subr.bf16.mxu0 %v627_v12  ;;  %v649_v39 = vld [vmem:[#allocation2 + $0x10] ss:$8 sps:$4 sm:$0xff]   ;;  %v656_v44 = vld [vmem:[#allocation2 + $0x14] ss:$8 sps:$4 sm:$0xff]   ;;  %v657_v45 = vld [vmem:[#allocation2 + $0x24] ss:$8 sps:$4 sm:$0xff]   ;;  %v76_v50 = vrot.slane %v655_v43, %v68_v37 }
  0x35   :  { %592 = vmatprep.subr.bf16.mxu1 %v628_v13  ;;  %v653_v41 = vld [vmem:[#allocation2 + $0x30] ss:$8 sps:$4 sm:$0xff]   ;;  %v83_v46 = vrot.slane %v649_v39, %v68_v37  ;;  %v658_v49 = vld [vmem:[#allocation2 + $0x34] ss:$8 sps:$4 sm:$0xff]   ;;  %v90_v51 = vrot.slane %v656_v44, %v68_v37  ;;  %v112_v52 = vrot.slane %v657_v45, %v68_v37  ;;  %v531_v3 = vld [vmem:[%s766_s2] ss:$0 sm:$0xff] }
  0x36   :  { %v119_v48 = vrot.slane %v653_v41, %v68_v37  ;;  %v126_v55 = vrot.slane %v658_v49, %v68_v37 }
  0x37   :  { %571 = vmatpush3.bf16.msra.mxu0 %v629_v14  ;;  %v92_v53 = vcombine.high %v69_v42, %v83_v46  ;;  %v91_v56 = vcombine.low %v69_v42, %v83_v46  ;;  %v94_v57 = vcombine.high %v76_v50, %v90_v51  ;;  %v93_v59 = vcombine.low %v76_v50, %v90_v51 }
  0x38   :  { %593 = vmatpush3.bf16.msra.mxu1 %v630_v15  ;;  %572 = vmatprep.subr.bf16.mxu0 %v631_v16  ;;  %v128_v54 = vcombine.high %v105_v47, %v119_v48  ;;  %v127_v58 = vcombine.low %v105_v47, %v119_v48  ;;  %v130_v61 = vcombine.high %v112_v52, %v126_v55 }
  0x39   :  { %594 = vmatprep.subr.bf16.mxu1 %v632_v17  ;;  %v129_v62 = vcombine.low %v112_v52, %v126_v55 }
  0x3a   :  { %v140_v60 = vpack.c.bf16 %v128_v54, %v92_v53  ;;  %v139_v63 = vpack.c.bf16 %v127_v58, %v91_v56  ;;  %v142_v0 = vpack.c.bf16 %v130_v61, %v94_v57 }
  0x3b   :  { %573 = vmatpush3.bf16.msra.mxu0 %v633_v18  ;;  %v141_v1 = vpack.c.bf16 %v129_v62, %v93_v59 }
  0x3c   :  { %595 = vmatpush3.bf16.msra.mxu1 %v634_v19  ;;  %574 = vmatprep.subr.bf16.mxu0 %v635_v20 }
  0x3d   :  { %596 = vmatprep.subr.bf16.mxu1 %v636_v21  ;;  %438 = vmatprep.mubr.bf16.mxu0 %v140_v60 }
  0x3e   :  { %479 = vmatprep.mubr.bf16.mxu1 %v142_v0 }
  0x3f   :  { %575 = vmatpush3.bf16.msra.mxu0 %v637_v22 }
  0x40   :  { %597 = vmatpush3.bf16.msra.mxu1 %v638_v23  ;;  %576 = vmatprep.subr.bf16.mxu0 %v639_v24 }
  0x41   :  { %598 = vmatprep.subr.bf16.mxu1 %v640_v28 }
  0x43   :  { %577 = vmatpush3.bf16.msra.mxu0 %v641_v29 }
  0x44   :  { %599 = vmatpush3.bf16.msra.mxu1 %v642_v30  ;;  %578 = vmatprep.subr.bf16.mxu0 %v643_v31 }
  0x45   :  { %600 = vmatprep.subr.bf16.mxu1 %v644_v34 }
  0x47   :  { %579 = vmatpush3.bf16.msra.mxu0 %v645_v35 }
  0x48   :  { %601 = vmatpush3.bf16.msra.mxu1 %v646_v36 }
  0x4a   :  { %439 = vmatmul.mubr.bf16.vlgmr.msra.gmra.mrb[0].mxu0 %v139_v63 }
  0x4b   :  { %480 = vmatmul.mubr.bf16.vlgmr.msra.gmra.mrb[0].mxu1 %v141_v1 }
 0x11d   :  { %v580_v2 = vpop.f32.mrb[0].mxu0 }
 0x11e   :  { %v581_v4 = vpop.f32.mrb[1].mxu0  ;;  %v602_v5 = vpop.f32.mrb[0].mxu1 }
 0x11f   :  { %v582_v6 = vadd.f32 %v581_v4, %v580_v2  ;;  %v583_v7 = vpop.f32.mrb[2].mxu0  ;;  %v603_v8 = vpop.f32.mrb[1].mxu1 }
 0x120   :  { %v584_v9 = vpop.f32.mrb[3].mxu0  ;;  %v604_v11 = vadd.f32 %v603_v8, %v602_v5  ;;  %v605_v12 = vpop.f32.mrb[2].mxu1 }
 0x121   :  { %v441_v10 = vadd.f32 %v582_v6, %v531_v3  ;;  %v606_v13 = vpop.f32.mrb[3].mxu1 }
 0x123   :  { %v482_v14 = vadd.f32 %v604_v11, %v441_v10 }
 0x125   :  { %488 = vst [vmem:[#allocation6] sm:$0xff] %v482_v14 }
 0x12c   :  { %v507_v15 = vld [vmem:[#allocation6] sm:$0x3] }
 0x12d   :  { %508 = vst [vmem:[%s767_s3] sm:$0x3] %v507_v15 }
 0x12e   :  { %525 = vsyncpa [#allocation3], 1 }
 0x12f   :  { %526 = vsyncpa [#allocation5], 1 }

</bundles_post_ra>
